<compile_context>
chip_gen: v7x
topology: tpu7x:2x2x1
jax: 0.10.0
libtpu: 0.0.40
codegen_flags: <defaults>
</compile_context>

<pallas_src>
import functools

import jax
import jax.numpy as jnp
from jax.experimental import pallas as pl
from jax.experimental.pallas import tpu as pltpu

H1 = 128
H2 = 64
H3 = 1


def _round_up(x, m):
    return ((x + m - 1) // m) * m


def _mlp_kernel(x_ref, w1_ref, b1_ref, w2_ref, b2_ref, w3r_ref, b3_ref, o_ref):
    """Fused 3-layer MLP on one batch tile. Everything lives in VMEM."""
    cd = w1_ref.dtype                      # compute dtype for the MXU (f32 or bf16)
    x = x_ref[...].astype(cd)

    # fc1 + ReLU  (MXU, f32 accumulation; bias/ReLU in f32 on the VPU)
    h1 = jnp.dot(x, w1_ref[...], preferred_element_type=jnp.float32)
    h1 = jnp.maximum(h1 + b1_ref[...], 0.0)

    # fc2 + ReLU
    h2 = jnp.dot(h1.astype(cd), w2_ref[...], preferred_element_type=jnp.float32)
    h2 = jnp.maximum(h2 + b2_ref[...], 0.0)

    # fc4 (64 -> 1): VPU multiply + XLU lane reduction instead of an N=1 MXU pass.
    y = jnp.sum(h2 * w3r_ref[...], axis=-1, keepdims=True) + b3_ref[...]

    o_ref[...] = y.astype(o_ref.dtype)


def sticker_sales_mlp(x, params, *, batch_tile=1024):
    """Forward pass.

    x:      [B, F] float32 or bfloat16 (bf16 halves the dominant HBM read traffic).
    params: dict with
      w1 [F, H1], w2 [H1, H2]   (may be bf16 or f32; stored as [in, out])
      b1 [1, H1], b2 [1, H2], w3 [H2, 1], b3 [1, 1]   (kept in f32)
    Returns [B, 1] float32.
    """
    B, F = x.shape
    w1 = params["w1"]
    w2 = params["w2"]
    b1 = params["b1"].astype(jnp.float32)
    b2 = params["b2"].astype(jnp.float32)
    w3_row = params["w3"].reshape(1, H2).astype(jnp.float32)
    b3 = params["b3"].reshape(1, 1).astype(jnp.float32)

    # Pick a batch tile: multiple of 16 (sublane-safe for f32 and bf16), clamped to the
    # (padded) batch so tiny demo batches do not pad up to a full 1024-row tile.
    bt = min(int(batch_tile), _round_up(B, 16))
    bt = _round_up(max(bt, 16), 16)
    padded_B = _round_up(B, bt)
    if padded_B != B:
        x = jnp.pad(x, ((0, padded_B - B), (0, 0)))   # zero rows; sliced off below
    grid = (padded_B // bt,)

    flops = 2 * padded_B * (F * H1 + H1 * H2 + H2 * H3)
    bytes_accessed = (
        padded_B * F * x.dtype.itemsize          # x reads (dominant)
        + padded_B * H3 * 4                      # y writes
        + w1.size * w1.dtype.itemsize
        + w2.size * w2.dtype.itemsize
        + (b1.size + b2.size + w3_row.size + b3.size) * 4
    )
    cost = pl.CostEstimate(flops=flops, transcendentals=0,
                           bytes_accessed=int(bytes_accessed))

    batch_map = lambda i: (i, 0)
    fixed_map = lambda i: (0, 0)   # constant block index -> weights stay resident in VMEM

    out = pl.pallas_call(
        _mlp_kernel,
        out_shape=jax.ShapeDtypeStruct((padded_B, H3), jnp.float32),
        grid_spec=pltpu.PrefetchScalarGridSpec(
            num_scalar_prefetch=0,
            grid=grid,
            in_specs=[
                pl.BlockSpec((bt, F), batch_map),    # x tile (pipelined over the grid)
                pl.BlockSpec((F, H1), fixed_map),    # w1
                pl.BlockSpec((1, H1), fixed_map),    # b1
                pl.BlockSpec((H1, H2), fixed_map),   # w2
                pl.BlockSpec((1, H2), fixed_map),    # b2
                pl.BlockSpec((1, H2), fixed_map),    # w3 as a row vector
                pl.BlockSpec((1, H3), fixed_map),    # b3
            ],
            out_specs=pl.BlockSpec((bt, H3), batch_map),
        ),
        compiler_params=pltpu.CompilerParams(
            dimension_semantics=("parallel",),       # megacore sharding on v7x; free elsewhere
            vmem_limit_bytes=32 * 1024 * 1024,       # safe on v5e/v6e/v7x; tiles are tiny
        ),
        cost_estimate=cost,
    )(x, w1, b1, w2, b2, w3_row, b3)

    return out[:B] if padded_B != B else out


def init_params(key, num_features):
    """Deterministic init matching nn.Linear (weights stored as [in, out]), in f32."""
    k1, k2, k3, k4, k5, k6 = jax.random.split(key, 6)

    def lin(kw, kb, fan_in, fan_out):
        bound = 1.0 / jnp.sqrt(jnp.float32(fan_in))
        w = jax.random.uniform(kw, (fan_in, fan_out), jnp.float32, -bound, bound)
        b = jax.random.uniform(kb, (1, fan_out), jnp.float32, -bound, bound)
        return w, b

    w1, b1 = lin(k1, k2, num_features, H1)
    w2, b2 = lin(k3, k4, H1, H2)
    w3, b3 = lin(k5, k6, H2, H3)
    return {"w1": w1, "b1": b1, "w2": w2, "b2": b2, "w3": w3, "b3": b3}


def cast_params(params, compute_dtype):
    """Cast the big matmul weights (fc1/fc2) to the compute dtype; keep the rest in f32."""
    p = dict(params)
    p["w1"] = params["w1"].astype(compute_dtype)
    p["w2"] = params["w2"].astype(compute_dtype)
    return p


def reference_forward(x, p):
    h1 = jnp.maximum(x @ p["w1"] + p["b1"], 0.0)
    h2 = jnp.maximum(h1 @ p["w2"] + p["b2"], 0.0)
    return h2 @ p["w3"] + p["b3"]


if __name__ == "__main__":
    key = jax.random.PRNGKey(0)
    num_features = 32
    kx, kp = jax.random.split(key)
    params_f32 = init_params(kp, num_features)

    # --- 1) f32 path, tiny batch, single tile: exactness check ----------------------------
    x_small = jax.random.normal(kx, (8, num_features), jnp.float32)
    out_small = jax.block_until_ready(sticker_sales_mlp(x_small, params_f32))
    ref_small = reference_forward(x_small, params_f32)
    assert out_small.shape == (8, 1)
    assert jnp.allclose(out_small, ref_small, atol=1e-5, rtol=1e-5), "f32 mismatch vs reference"

    # --- 2) bf16 fast path, ragged batch, multi-step grid (pipelined / megacore) ----------
    B = 1000  # not a tile multiple: exercises padding + output slicing
    x_big = jax.random.normal(jax.random.fold_in(kx, 1), (B, num_features), jnp.float32)
    params_bf16 = cast_params(params_f32, jnp.bfloat16)
    out_big = jax.block_until_ready(
        sticker_sales_mlp(x_big.astype(jnp.bfloat16), params_bf16, batch_tile=256))
    ref_big = reference_forward(x_big, params_f32)
    assert out_big.shape == (B, 1)
    assert jnp.allclose(out_big, ref_big, atol=2e-2, rtol=2e-2), "bf16 mismatch vs f32 reference"

    print("KERNEL_OK")
</pallas_src>

<mosaic_0001>
module attributes {stable_mosaic.version = 11 : i64} {
  func.func @_mlp_kernel(%arg0: i32, %arg1: memref<16x32xf32, #tpu.memory_space<vmem>>, %arg2: memref<32x128xf32, #tpu.memory_space<vmem>>, %arg3: memref<1x128xf32, #tpu.memory_space<vmem>>, %arg4: memref<128x64xf32, #tpu.memory_space<vmem>>, %arg5: memref<1x64xf32, #tpu.memory_space<vmem>>, %arg6: memref<1x64xf32, #tpu.memory_space<vmem>>, %arg7: memref<1x1xf32, #tpu.memory_space<vmem>>, %arg8: memref<16x1xf32, #tpu.memory_space<vmem>>) attributes {dimension_semantics = [#tpu.dimension_semantics<parallel>], iteration_bounds = array<i64: 1>, scalar_prefetch = 0 : i64, scratch_operands = 0 : i64, tpu.core_type = #tpu.core_type<tc>, window_params = [{transform_indices = @transform_0, window_bounds = array<i64: 16, 32>}, {pipeline_mode = #tpu.pipeline_mode<synchronous>, transform_indices = @transform_1, window_bounds = array<i64: 32, 128>}, {pipeline_mode = #tpu.pipeline_mode<synchronous>, transform_indices = @transform_2, window_bounds = array<i64: 1, 128>}, {pipeline_mode = #tpu.pipeline_mode<synchronous>, transform_indices = @transform_3, window_bounds = array<i64: 128, 64>}, {pipeline_mode = #tpu.pipeline_mode<synchronous>, transform_indices = @transform_4, window_bounds = array<i64: 1, 64>}, {pipeline_mode = #tpu.pipeline_mode<synchronous>, transform_indices = @transform_5, window_bounds = array<i64: 1, 64>}, {pipeline_mode = #tpu.pipeline_mode<synchronous>, transform_indices = @transform_6, window_bounds = array<i64: 1, 1>}, {transform_indices = @transform_7, window_bounds = array<i64: 16, 1>}]} {
    %c0 = arith.constant 0 : index
    %c0_0 = arith.constant 0 : index
    %0 = vector.load %arg1[%c0, %c0_0] : memref<16x32xf32, #tpu.memory_space<vmem>>, vector<16x32xf32>
    %c0_1 = arith.constant 0 : index
    %c0_2 = arith.constant 0 : index
    %1 = vector.load %arg2[%c0_1, %c0_2] : memref<32x128xf32, #tpu.memory_space<vmem>>, vector<32x128xf32>
    %cst = arith.constant dense<0.000000e+00> : vector<16x128xf32>
    %2 = tpu.matmul %0, %1, %cst {dimension_numbers = #tpu.dot_dimension_numbers<[1], [0], [0], [1], [0, 0, 1, 1], [], []>} : vector<16x32xf32>, vector<32x128xf32>, vector<16x128xf32> -> vector<16x128xf32>
    %c0_3 = arith.constant 0 : index
    %c0_4 = arith.constant 0 : index
    %3 = vector.load %arg3[%c0_3, %c0_4] : memref<1x128xf32, #tpu.memory_space<vmem>>, vector<1x128xf32>
    %4 = vector.broadcast %3 : vector<1x128xf32> to vector<16x128xf32>
    %5 = arith.addf %2, %4 : vector<16x128xf32>
    %cst_5 = arith.constant 0.000000e+00 : f32
    %6 = vector.broadcast %cst_5 : f32 to vector<16x128xf32>
    %7 = arith.maximumf %5, %6 : vector<16x128xf32>
    %c0_6 = arith.constant 0 : index
    %c0_7 = arith.constant 0 : index
    %8 = vector.load %arg4[%c0_6, %c0_7] : memref<128x64xf32, #tpu.memory_space<vmem>>, vector<128x64xf32>
    %cst_8 = arith.constant dense<0.000000e+00> : vector<16x64xf32>
    %9 = tpu.matmul %7, %8, %cst_8 {dimension_numbers = #tpu.dot_dimension_numbers<[1], [0], [0], [1], [0, 0, 1, 1], [], []>} : vector<16x128xf32>, vector<128x64xf32>, vector<16x64xf32> -> vector<16x64xf32>
    %c0_9 = arith.constant 0 : index
    %c0_10 = arith.constant 0 : index
    %10 = vector.load %arg5[%c0_9, %c0_10] : memref<1x64xf32, #tpu.memory_space<vmem>>, vector<1x64xf32>
    %11 = vector.broadcast %10 : vector<1x64xf32> to vector<16x64xf32>
    %12 = arith.addf %9, %11 : vector<16x64xf32>
    %cst_11 = arith.constant 0.000000e+00 : f32
    %13 = vector.broadcast %cst_11 : f32 to vector<16x64xf32>
    %14 = arith.maximumf %12, %13 : vector<16x64xf32>
    %c0_12 = arith.constant 0 : index
    %c0_13 = arith.constant 0 : index
    %15 = vector.load %arg6[%c0_12, %c0_13] : memref<1x64xf32, #tpu.memory_space<vmem>>, vector<1x64xf32>
    %16 = vector.broadcast %15 : vector<1x64xf32> to vector<16x64xf32>
    %17 = arith.mulf %14, %16 : vector<16x64xf32>
    %cst_14 = arith.constant dense<0.000000e+00> : vector<16xf32>
    %18 = vector.multi_reduction <add>, %17, %cst_14 [1] : vector<16x64xf32> to vector<16xf32>
    %19 = vector.shape_cast %18 : vector<16xf32> to vector<16x1xf32>
    %c0_15 = arith.constant 0 : index
    %c0_16 = arith.constant 0 : index
    %20 = vector.load %arg7[%c0_15, %c0_16] : memref<1x1xf32, #tpu.memory_space<vmem>>, vector<1x1xf32>
    %21 = vector.broadcast %20 : vector<1x1xf32> to vector<16x1xf32>
    %22 = arith.addf %19, %21 : vector<16x1xf32>
    %c0_17 = arith.constant 0 : index
    %c0_18 = arith.constant 0 : index
    %23 = vector.load %arg8[%c0_17, %c0_18] : memref<16x1xf32, #tpu.memory_space<vmem>>, vector<16x1xf32>
    tpu.vector_store %arg8[%c0_17, %c0_18], %22 {strides = array<i32>} : memref<16x1xf32, #tpu.memory_space<vmem>>, vector<16x1xf32>,
    return
  }
  func.func @transform_0(%arg0: i32) -> (i32, i32) {
    %c0_i32 = arith.constant 0 : i32
    %c0_i32_0 = arith.constant 0 : i32
    return %arg0, %c0_i32 : i32, i32
  }
  func.func @transform_1(%arg0: i32) -> (i32, i32) {
    %c0_i32 = arith.constant 0 : i32
    %c0_i32_0 = arith.constant 0 : i32
    %c0_i32_1 = arith.constant 0 : i32
    return %c0_i32, %c0_i32_0 : i32, i32
  }
  func.func @transform_2(%arg0: i32) -> (i32, i32) {
    %c0_i32 = arith.constant 0 : i32
    %c0_i32_0 = arith.constant 0 : i32
    %c0_i32_1 = arith.constant 0 : i32
    return %c0_i32, %c0_i32_0 : i32, i32
  }
  func.func @transform_3(%arg0: i32) -> (i32, i32) {
    %c0_i32 = arith.constant 0 : i32
    %c0_i32_0 = arith.constant 0 : i32
    %c0_i32_1 = arith.constant 0 : i32
    return %c0_i32, %c0_i32_0 : i32, i32
  }
  func.func @transform_4(%arg0: i32) -> (i32, i32) {
    %c0_i32 = arith.constant 0 : i32
    %c0_i32_0 = arith.constant 0 : i32
    %c0_i32_1 = arith.constant 0 : i32
    return %c0_i32, %c0_i32_0 : i32, i32
  }
  func.func @transform_5(%arg0: i32) -> (i32, i32) {
    %c0_i32 = arith.constant 0 : i32
    %c0_i32_0 = arith.constant 0 : i32
    %c0_i32_1 = arith.constant 0 : i32
    return %c0_i32, %c0_i32_0 : i32, i32
  }
  func.func @transform_6(%arg0: i32) -> (i32, i32) {
    %c0_i32 = arith.constant 0 : i32
    %c0_i32_0 = arith.constant 0 : i32
    %c0_i32_1 = arith.constant 0 : i32
    return %c0_i32, %c0_i32_0 : i32, i32
  }
  func.func @transform_7(%arg0: i32) -> (i32, i32) {
    %c0_i32 = arith.constant 0 : i32
    %c0_i32_0 = arith.constant 0 : i32
    return %arg0, %c0_i32 : i32, i32
  }
}

</mosaic_0001>

<bundles_post_ra>
// kernel: tpu_custom_call.1
= control target key start
LH: loop header
LB: loop body
LE: loop exit
PB: predicated region body
PF: predicated region fallthrough
CT: control target
= control target key end

     0   :  { %vm41_vm0 = vcmask 261120   ;;  %vm234_vm1 = vcmask 523264   ;;  %vm250_vm2 = vcmask 7168   ;;  %s499_s1 = inlined_call_operand.vmem [shape: f32[32,128], index: 1, kind: input, shape index: {}]   ;;  %s500_s0 = inlined_call_operand.vmem [shape: f32[16,32], index: 0, kind: input, shape index: {}]   ;;  %s501_s3 = inlined_call_operand.vmem [shape: f32[128,64], index: 3, kind: input, shape index: {}]   ;;  %s502_s2 = inlined_call_operand.vmem [shape: f32[1,128], index: 2, kind: input, shape index: {}]   ;;  %s503_s6 = inlined_call_operand.<no memory space> [shape: f32[1,1], index: 6, kind: input, shape index: {}]   ;;  %s504_s4 = inlined_call_operand.vmem [shape: f32[1,64], index: 4, kind: input, shape index: {}]   ;;  %s505_s5 = inlined_call_operand.vmem [shape: f32[1,64], index: 5, kind: input, shape index: {}]   ;;  %s506_s7 = inlined_call_operand.vmem [shape: f32[16,1], index: 7, kind: output, shape index: {}]  }
   0x1   :  { %v30_v0 = vld [vmem:[%s499_s1] sm:$0xff]  ;;  %v31_v1 = vld [vmem:[%s499_s1 + $0x8] sm:$0xff]  ;;  %v32_v2 = vld [vmem:[%s499_s1 + $0x10] sm:$0xff]  ;;  %v12_v39 = vstv %s503_s6 }
   0x2   :  { %v333_v3 = vpack.c.bf16 %v31_v1, %v30_v0  ;;  %v33_v4 = vld [vmem:[%s499_s1 + $0x18] sm:$0xff]  ;;  %v28_v5 = vld [vmem:[%s500_s0] sm:$0xff]  ;;  %v126_v8 = vld [vmem:[%s501_s3 + $0x8] sm:$0xff]  ;;  %13 = vst [vmem:[#allocation2] sm:$0x1] %v12_v39 }
   0x3   :  { %v337_v6 = vpack.c.bf16 %v33_v4, %v32_v2  ;;  %295 = vmatprep.mubr.msk.f32.mxu0 %vm41_vm0, %v28_v5  ;;  %v125_v7 = vld [vmem:[%s501_s3] sm:$0xff]  ;;  %v127_v9 = vld [vmem:[%s501_s3 + $0x10] sm:$0xff]  ;;  %v128_v11 = vld [vmem:[%s501_s3 + $0x18] sm:$0xff] }
   0x4   :  { %334 = vmatprep.subr.bf16.mxu0 %v333_v3  ;;  %v341_v10 = vpack.c.bf16 %v126_v8, %v125_v7  ;;  %v345_v12 = vpack.c.bf16 %v128_v11, %v127_v9  ;;  %v129_v13 = vld [vmem:[%s501_s3 + $0x20] sm:$0xff]  ;;  %v130_v14 = vld [vmem:[%s501_s3 + $0x28] sm:$0xff]  ;;  %v131_v17 = vld [vmem:[%s501_s3 + $0x30] sm:$0xff] }
   0x5   :  { %336 = vmatpush3.bf16.msra.mxu0 %v333_v3  ;;  %v349_v15 = vpack.c.bf16 %v130_v14, %v129_v13  ;;  %v29_v16 = vld [vmem:[%s500_s0 + $0x8] sm:$0xff]  ;;  %v132_v18 = vld [vmem:[%s501_s3 + $0x38] sm:$0xff]  ;;  %v133_v20 = vld [vmem:[%s501_s3 + $0x40] sm:$0xff] }
   0x6   :  { %338 = vmatprep.subr.bf16.mxu0 %v337_v6  ;;  %342 = vmatprep.subr.bf16.mxu1 %v341_v10  ;;  %v353_v19 = vpack.c.bf16 %v132_v18, %v131_v17  ;;  %v134_v21 = vld [vmem:[%s501_s3 + $0x48] sm:$0xff]  ;;  %v135_v23 = vld [vmem:[%s501_s3 + $0x50] sm:$0xff]  ;;  %v136_v24 = vld [vmem:[%s501_s3 + $0x58] sm:$0xff] }
   0x7   :  { %344 = vmatpush3.bf16.msra.mxu1 %v341_v10  ;;  %v357_v22 = vpack.c.bf16 %v134_v21, %v133_v20  ;;  %v361_v25 = vpack.c.bf16 %v136_v24, %v135_v23  ;;  %v137_v26 = vld [vmem:[%s501_s3 + $0x60] sm:$0xff]  ;;  %v138_v27 = vld [vmem:[%s501_s3 + $0x68] sm:$0xff]  ;;  %v139_v29 = vld [vmem:[%s501_s3 + $0x70] sm:$0xff] }
   0x8   :  { %346 = vmatprep.subr.bf16.mxu1 %v345_v12  ;;  %v365_v28 = vpack.c.bf16 %v138_v27, %v137_v26  ;;  %v140_v30 = vld [vmem:[%s501_s3 + $0x78] sm:$0xff]  ;;  %v257_v32 = vld [vmem:[%s502_s2] ss:$0 sm:$0xff] }
   0x9   :  { %340 = vmatpush3.bf16.msra.mxu0 %v337_v6  ;;  %v369_v31 = vpack.c.bf16 %v140_v30, %v139_v29  ;;  %v260_v40 = vld [vmem:[%s504_s4] ss:$0 sm:$0xff] }
   0xa   :  { %v261_v45 = vld [vmem:[%s505_s5] ss:$0 sm:$0xff] }
   0xb   :  { %348 = vmatpush3.bf16.msra.mxu1 %v345_v12  ;;  %v262_v52 = vld [vmem:[#allocation2] ss:$0 sm:$0xff] }
   0xc   :  { %296 = vmatmul.mubr.msk.f32.vlgmr.msra.gmra.mrb[0].mxu0 %vm41_vm0, %v29_v16  ;;  %350 = vmatprep.subr.bf16.mxu1 %v349_v15 }
   0xf   :  { %352 = vmatpush3.bf16.msra.mxu1 %v349_v15 }
  0x10   :  { %354 = vmatprep.subr.bf16.mxu1 %v353_v19 }
  0x13   :  { %356 = vmatpush3.bf16.msra.mxu1 %v353_v19 }
  0x14   :  { %358 = vmatprep.subr.bf16.mxu1 %v357_v22 }
  0x17   :  { %360 = vmatpush3.bf16.msra.mxu1 %v357_v22 }
  0x18   :  { %362 = vmatprep.subr.bf16.mxu1 %v361_v25 }
  0x1b   :  { %364 = vmatpush3.bf16.msra.mxu1 %v361_v25 }
  0x1c   :  { %366 = vmatprep.subr.bf16.mxu1 %v365_v28 }
  0x1f   :  { %368 = vmatpush3.bf16.msra.mxu1 %v365_v28 }
  0x20   :  { %370 = vmatprep.subr.bf16.mxu1 %v369_v31 }
  0x23   :  { %372 = vmatpush3.bf16.msra.mxu1 %v369_v31 }
  0xdf   :  { %v297_v33 = vpop.f32.mrb[0].mxu0 }
  0xe0   :  { %v120_v34 = vadd.f32 %v297_v33, %v257_v32  ;;  %v114_v35 = vpop.f32.mrb[1].mxu0 }
  0xe1   :  { %v115_v36 = vadd.f32 %v257_v32, %v114_v35 }
  0xe2   :  { %v124_v38 = vmax.f32 %v120_v34, 0.0 }
  0xe3   :  { %v123_v37 = vmax.f32 %v115_v36, 0.0 }
  0xe5   :  { %330 = vmatprep.mubr.f32.mxu1 %v123_v37 }
  0xe6   :  { %331 = vmatmul.mubr.f32.vlgmr.msra.gmra.mrb[0].mxu1 %v124_v38 }
 0x1b9   :  { %v332_v41 = vpop.f32.mrb[0].mxu1 }
 0x1ba   :  { %v220_v42 = vadd.f32 %v332_v41, %v260_v40  ;;  %v214_v43 = vpop.f32.mrb[1].mxu1 }
 0x1bb   :  { %v215_v44 = vadd.f32 %v260_v40, %v214_v43 }
 0x1bc   :  { %v224_v46 = vmax.f32 %v220_v42, 0.0 }
 0x1bd   :  { %v223_v47 = vmax.f32 %v215_v44, 0.0 }
 0x1be   :  { %v233_v50 = vmul.f32 %v261_v45, %v224_v46 }
 0x1bf   :  { %v232_v48 = vmul.f32 %v261_v45, %v223_v47 }
 0x1c0   :  { %v238_v51 = vsel %vm234_vm1, %v233_v50, 0.0 }
 0x1c1   :  { %v235_v49 = vsel %vm234_vm1, %v232_v48, 0.0 }
 0x1c2   :  { %236 = vadd.xlane.f32.xlu0 %v235_v49 }
 0x1c6   :  { %239 = vadd.xlane.f32.xlu0 %v238_v51 }
 0x24f   :  { %v237_v53 = vpop.xlane.xlu0 %236 }
 0x250   :  { %v248_v54 = vadd.f32 %v262_v52, %v237_v53 }
 0x252   :  { %251 = vst.msk [vmem:[%s506_s7] sm:$0xff] %vm250_vm2, %v248_v54 }
 0x253   :  { %v240_v55 = vpop.xlane.xlu0 %239 }
 0x254   :  { %v249_v56 = vadd.f32 %v262_v52, %v240_v55 }
 0x256   :  { %252 = vst.msk [vmem:[%s506_s7 + $0x8] sm:$0xff] %vm250_vm2, %v249_v56 }

</bundles_post_ra>
